<compile_context>
chip_gen: v5e
topology: v5e:2x2
jax: 0.10.0
libtpu: 0.0.40
codegen_flags: <defaults>
</compile_context>

<pallas_src>
import math

import jax
import jax.numpy as jnp
from jax.experimental import pallas as pl
from jax.experimental.pallas import tpu as pltpu

_TARGET_BLOCK_BYTES = 4 << 20          # ~4 MiB per block (per perf review)
_VMEM_LIMIT_BYTES = 32 << 20           # safe on v5e/v6e/v7x


def _h_swish_kernel(x_ref, o_ref):
    x = x_ref[...]
    # Weak-typed python constants keep the input dtype (no forced f32 upcast).
    y = x * jnp.clip(x + 3.0, 0.0, 6.0) * (1.0 / 6.0)
    o_ref[...] = y.astype(o_ref.dtype)


def _h_sigmoid_kernel(x_ref, o_ref):
    x = x_ref[...]
    y = jnp.clip(x + 3.0, 0.0, 6.0) * (1.0 / 6.0)
    o_ref[...] = y.astype(o_ref.dtype)


def _h_swish_jnp(x):
    return x * jnp.clip(x + 3.0, 0.0, 6.0) * (1.0 / 6.0)


def _h_sigmoid_jnp(x):
    return jnp.clip(x + 3.0, 0.0, 6.0) * (1.0 / 6.0)


def _round_up(a, b):
    return ((a + b - 1) // b) * b


def _choose_tm(rows, sublane, max_tm):
    """Pick the row-tile size.  Prefers >=2 grid blocks (v7x megacore)."""
    if rows <= sublane:
        # Single full-extent block (block dim == array dim is always legal).
        return rows
    tm = min(max_tm, _round_up(rows, sublane))
    if tm >= rows:
        # Split into >= 2 row blocks so both v7x TensorCores get work.
        tm = _round_up(pl.cdiv(rows, 2), sublane)
    return tm


def _elementwise_call(kernel, jnp_fn, x, *, donate=False):
    """Run an elementwise Pallas kernel over x via a lane-dense tiled slab."""
    orig_shape = x.shape
    n = math.prod(orig_shape)
    if n == 0:
        return jnp_fn(x)

    itemsize = jnp.dtype(x.dtype).itemsize
    # Packed-sublane multiple per dtype width (f32:8, bf16:16, int8/fp8:32).
    sublane = {4: 8, 2: 16, 1: 32}.get(itemsize, 8)

    # Pick a lane width that divides n so no pad/slice pass is needed.
    lane = None
    for cand in (1024, 512, 256, 128):
        if n % cand == 0:
            lane = cand
            break
    if lane is None:
        lane = 1024  # fallback: kernel on prefix, tiny tail in plain jnp

    flat = x.reshape(-1)
    main = (n // lane) * lane
    rows = main // lane

    if rows == 0:
        # Tiny tensor (< one lane row): not worth a kernel launch.
        return jnp_fn(x)

    tail_out = None
    if main < n:
        # Rare fallback path (shape has no 128-divisible factor).
        tail_out = jnp_fn(flat[main:])
        head = flat[:main]
    else:
        head = flat
    x2d = head.reshape(rows, lane)

    max_tm = max(sublane, (_TARGET_BLOCK_BYTES // (lane * itemsize)))
    max_tm = max(sublane, (max_tm // sublane) * sublane)
    tm = _choose_tm(rows, sublane, max_tm)
    grid = (pl.cdiv(rows, tm),)

    out2d = pl.pallas_call(
        kernel,
        out_shape=jax.ShapeDtypeStruct((rows, lane), x.dtype),
        grid=grid,
        in_specs=[pl.BlockSpec((tm, lane), lambda i: (i, 0))],
        out_specs=pl.BlockSpec((tm, lane), lambda i: (i, 0)),
        compiler_params=pltpu.CompilerParams(
            dimension_semantics=("parallel",),
            vmem_limit_bytes=_VMEM_LIMIT_BYTES,
        ),
        input_output_aliases=({0: 0} if donate else {}),
    )(x2d)

    if tail_out is None:
        return out2d.reshape(orig_shape)
    # Fallback path only: stitch prefix + tail (one extra copy of the prefix).
    return jnp.concatenate([out2d.reshape(-1), tail_out]).reshape(orig_shape)


def h_sigmoid(x, donate=False):
    """Elementwise h_sigmoid = ReLU6(x + 3) / 6 (Pallas TPU kernel)."""
    return _elementwise_call(_h_sigmoid_kernel, _h_sigmoid_jnp, x, donate=donate)


def h_swish(x, donate=False):
    """Elementwise h_swish = x * ReLU6(x + 3) / 6 (Pallas TPU kernel)."""
    return _elementwise_call(_h_swish_kernel, _h_swish_jnp, x, donate=donate)


if __name__ == "__main__":
    key = jax.random.PRNGKey(0)
    x = jax.random.normal(key, (2, 4, 16, 16), dtype=jnp.float32) * 4.0

    y = h_swish(x)
    jax.block_until_ready(y)

    # Reference (same semantics as torch: x * ReLU6(x + 3) / 6).
    ref = x * jnp.clip(x + 3.0, 0.0, 6.0) / 6.0
    assert y.shape == x.shape and y.dtype == x.dtype
    assert jnp.allclose(y, ref, atol=1e-6), "h_swish mismatch vs reference"

    # Also sanity-check the dependent h_sigmoid kernel.
    ys = h_sigmoid(x)
    jax.block_until_ready(ys)
    refs = jnp.clip(x + 3.0, 0.0, 6.0) / 6.0
    assert jnp.allclose(ys, refs, atol=1e-6), "h_sigmoid mismatch vs reference"

    print("KERNEL_OK")
</pallas_src>

<mosaic_0001>
module attributes {stable_mosaic.version = 11 : i64} {
  func.func @_h_swish_kernel(%arg0: i32, %arg1: memref<2x1024xf32, #tpu.memory_space<vmem>>, %arg2: memref<2x1024xf32, #tpu.memory_space<vmem>>) attributes {dimension_semantics = [#tpu.dimension_semantics<parallel>], iteration_bounds = array<i64: 1>, scalar_prefetch = 0 : i64, scratch_operands = 0 : i64, tpu.core_type = #tpu.core_type<tc>, window_params = [{transform_indices = @transform_0, window_bounds = array<i64: 2, 1024>}, {transform_indices = @transform_1, window_bounds = array<i64: 2, 1024>}]} {
    %c0 = arith.constant 0 : index
    %c0_0 = arith.constant 0 : index
    %0 = vector.load %arg1[%c0, %c0_0] : memref<2x1024xf32, #tpu.memory_space<vmem>>, vector<2x1024xf32>
    %cst = arith.constant 3.000000e+00 : f32
    %1 = vector.broadcast %cst : f32 to vector<2x1024xf32>
    %2 = arith.addf %0, %1 : vector<2x1024xf32>
    %cst_1 = arith.constant 0.000000e+00 : f32
    %cst_2 = arith.constant 6.000000e+00 : f32
    %3 = vector.broadcast %cst_1 : f32 to vector<2x1024xf32>
    %4 = arith.maximumf %3, %2 : vector<2x1024xf32>
    %5 = vector.broadcast %cst_2 : f32 to vector<2x1024xf32>
    %6 = arith.minimumf %5, %4 : vector<2x1024xf32>
    %7 = arith.mulf %0, %6 : vector<2x1024xf32>
    %cst_3 = arith.constant 0.166666672 : f32
    %8 = vector.broadcast %cst_3 : f32 to vector<2x1024xf32>
    %9 = arith.mulf %7, %8 : vector<2x1024xf32>
    %c0_4 = arith.constant 0 : index
    %c0_5 = arith.constant 0 : index
    %10 = vector.load %arg2[%c0_4, %c0_5] : memref<2x1024xf32, #tpu.memory_space<vmem>>, vector<2x1024xf32>
    tpu.vector_store %arg2[%c0_4, %c0_5], %9 {strides = array<i32>} : memref<2x1024xf32, #tpu.memory_space<vmem>>, vector<2x1024xf32>,
    return
  }
  func.func @transform_0(%arg0: i32) -> (i32, i32) {
    %c0_i32 = arith.constant 0 : i32
    %c0_i32_0 = arith.constant 0 : i32
    return %arg0, %c0_i32 : i32, i32
  }
  func.func @transform_1(%arg0: i32) -> (i32, i32) {
    %c0_i32 = arith.constant 0 : i32
    %c0_i32_0 = arith.constant 0 : i32
    return %arg0, %c0_i32 : i32, i32
  }
}

</mosaic_0001>

<bundles_post_ra>
// kernel: tpu_custom_call.1
= control target key start
LH: loop header
LB: loop body
LE: loop exit
PB: predicated region body
PF: predicated region fallthrough
CT: control target
= control target key end

     0   :  { %6 = vsyncpa [#allocation3], 0  ;;  %s126_s0 = inlined_call_operand.hbm [shape: f32[2,1024], index: 0, kind: input, shape index: {}]   ;;  %s127_s1 = inlined_call_operand.hbm [shape: f32[2,1024], index: 1, kind: output, shape index: {}]  }
   0x1   :  { %7 = vsyncpa [#allocation4], 0  ;;  %s13_s8 = sshll.u32 %s126_s0, 4  ;;  %s108_s9 = smov [#allocation2]   ;;  %s14_s8 = int_to_ptr.hbm [resolvable:$true] %s13_s8 }
   0x2   :  { %s15_s10 = sshll.u32 %s108_s9, 4  ;;  %s16_s10 = int_to_ptr.vmem [resolvable:$true] %s15_s10 }
   0x3   :  { %18 = dma.hbm_to_vmem [thread:$0]  %s14_s8, 256, %s16_s10, [#allocation3]  }
   0x4   :  { %104 = dma.done.wait [#allocation3], 256  }
   0x5   :  { %105 = vsyncadd [#allocation3], 4294967040  ;;  %v23_v0 = vld [vmem:[#allocation2] sm:$0xff]  ;;  %v24_v1 = vld [vmem:[#allocation2 + $0x8] sm:$0xff]  ;;  %s109_s11 = smov [#allocation5]   ;;  %s44_s14 = sshll.u32 %s127_s1, 4  ;;  %s45_s14 = int_to_ptr.hbm [resolvable:$true] %s44_s14 }
   0x6   :  { %v25_v2 = vadd.f32 3.0, %v23_v0  ;;  %v26_v3 = vadd.f32 3.0, %v24_v1  ;;  %s42_s12 = sshll.u32 %s109_s11, 4  ;;  %s43_s12 = int_to_ptr.vmem [resolvable:$true] %s42_s12 }
   0x8   :  { %v27_v4 = vmax.f32 %v25_v2, 0.0  ;;  %v28_v5 = vmax.f32 %v26_v3, 0.0 }
   0xa   :  { %v29_v6 = vmin.f32 %v27_v4, 6.0  ;;  %v30_v7 = vmin.f32 %v28_v5, 6.0 }
   0xc   :  { %v31_v8 = vmul.f32 %v29_v6, %v23_v0  ;;  %v32_v9 = vmul.f32 %v30_v7, %v24_v1 }
   0xe   :  { %v33_v10 = vmul.f32 0.16666667, %v31_v8  ;;  %v34_v11 = vmul.f32 0.16666667, %v32_v9 }
  0x10   :  { %35 = vst [vmem:[#allocation5] sm:$0xff] %v33_v10 }
  0x11   :  { %36 = vst [vmem:[#allocation5 + $0x8] sm:$0xff] %v34_v11 }
  0x12   :  { %47 = dma.vmem_to_hbm [thread:$0]  %s43_s12, 256, %s45_s14, [#allocation4]  }
  0x13   :  { %106 = dma.done.wait [#allocation4], 256  }
  0x14   :  { %107 = vsyncadd [#allocation4], 4294967040 }
  0x15   :  { %52 = vsyncpa [#allocation3], 1 }
  0x16   :  { %53 = vsyncpa [#allocation4], 1 }

</bundles_post_ra>
